<compile_context>
chip_gen: v6e
topology: v6e:2x2x1
jax: 0.10.0
libtpu: 0.0.40
codegen_flags: <defaults>
</compile_context>

<pallas_src>
import functools
import math

import jax
import jax.numpy as jnp
from jax import lax
from jax.experimental import pallas as pl
from jax.experimental.pallas import tpu as pltpu


def _round_up(x, m):
    return ((x + m - 1) // m) * m


def _gelu(x, approximate):
    if approximate:
        # tanh-approximate GELU: lowers to the EUP (separate bundle slot from VPU/MXU).
        c = math.sqrt(2.0 / math.pi)
        return 0.5 * x * (1.0 + jnp.tanh(c * (x + 0.044715 * (x * x * x))))
    # PyTorch F.gelu default (approximate='none'): 0.5 * x * (1 + erf(x / sqrt(2)))
    return 0.5 * x * (1.0 + lax.erf(x * (1.0 / math.sqrt(2.0))))


def decoder_jet_kernel(z_ref, w1_ref, b1_ref, w2_ref, b2_ref, w3_ref, b3_ref, o_ref,
                       *, approximate):
    cdt = w1_ref.dtype  # MXU input dtype (bf16 or f32); accumulation is always f32.

    x = z_ref[...].astype(cdt)

    h = jnp.dot(x, w1_ref[...], preferred_element_type=jnp.float32) + b1_ref[...]
    h = _gelu(h, approximate)

    h = jnp.dot(h.astype(cdt), w2_ref[...], preferred_element_type=jnp.float32) + b2_ref[...]
    h = _gelu(h, approximate)

    out = jnp.dot(h.astype(cdt), w3_ref[...], preferred_element_type=jnp.float32) + b3_ref[...]
    o_ref[...] = out.astype(o_ref.dtype)


def prepare_params(params, *, use_bf16=True):
    """One-time weight preprocessing (hoisted out of the per-call forward path).

    Weights stored (in, out); biases cast to f32 and reshaped to (1, dim) so they add
    directly onto the f32 MXU accumulator inside the kernel."""
    cdt = jnp.bfloat16 if use_bf16 else jnp.float32
    return {
        "w1": params["w1"].astype(cdt),
        "w2": params["w2"].astype(cdt),
        "w3": params["w3"].astype(cdt),
        "b1": params["b1"].astype(jnp.float32).reshape(1, -1),
        "b2": params["b2"].astype(jnp.float32).reshape(1, -1),
        "b3": params["b3"].astype(jnp.float32).reshape(1, -1),
    }


def decoder_jet_forward(z, prepared, *, block_b=4096, approximate_gelu=False):
    """z: (B, z_dim) float32. prepared: output of prepare_params()."""
    B, z_dim = z.shape
    hidden_dim = prepared["w1"].shape[1]
    output_dim = prepared["w3"].shape[1]

    # Pad the batch only to a sublane multiple (<= 7 rows) -- never a full re-copy of z.
    B_p = _round_up(B, 8)
    if B_p != B:
        z = jnp.pad(z, ((0, B_p - B), (0, 0)))

    # Large batch tiles amortize the ~0.35us per-grid-step overhead; clamp to the batch.
    # Ragged last blocks (B_p not a multiple of block_b) are handled by Pallas: OOB input
    # rows are garbage but their output rows are never committed.
    block_b = max(8, min(_round_up(block_b, 8), B_p))
    grid = (pl.cdiv(B_p, block_b),)

    kernel = functools.partial(decoder_jet_kernel, approximate=approximate_gelu)

    out = pl.pallas_call(
        kernel,
        out_shape=jax.ShapeDtypeStruct((B_p, output_dim), z.dtype),
        grid_spec=pltpu.PrefetchScalarGridSpec(
            num_scalar_prefetch=0,
            grid=grid,
            in_specs=[
                pl.BlockSpec((block_b, z_dim), lambda i: (i, 0)),          # z tile
                pl.BlockSpec((z_dim, hidden_dim), lambda i: (0, 0)),       # w1 (resident)
                pl.BlockSpec((1, hidden_dim), lambda i: (0, 0)),           # b1
                pl.BlockSpec((hidden_dim, hidden_dim), lambda i: (0, 0)),  # w2 (resident)
                pl.BlockSpec((1, hidden_dim), lambda i: (0, 0)),           # b2
                pl.BlockSpec((hidden_dim, output_dim), lambda i: (0, 0)),  # w3 (resident)
                pl.BlockSpec((1, output_dim), lambda i: (0, 0)),           # b3
            ],
            # Narrow output block: last dim equals the full array dim, so this is legal;
            # the store is masked in VMEM but HBM writeback is only B*output_dim elements.
            out_specs=pl.BlockSpec((block_b, output_dim), lambda i: (i, 0)),
        ),
        compiler_params=pltpu.CompilerParams(
            dimension_semantics=("parallel",),
            # ~10 MB needed at block_b=4096 (f32 intermediates dominate); 48 MB gives
            # headroom up to block_b~8192 while staying under v7x's 64 MiB physical VMEM.
            vmem_limit_bytes=48 * 1024 * 1024,
        ),
    )(z, prepared["w1"], prepared["b1"], prepared["w2"], prepared["b2"],
      prepared["w3"], prepared["b3"])

    return out[:B] if B_p != B else out


def init_params(key, z_dim=32, hidden_dim=128, output_dim=4, dtype=jnp.float32):
    """Deterministic synthetic params (PyTorch nn.Linear-style uniform init),
    stored as (in, out) so the kernel does x @ W + b."""
    keys = jax.random.split(key, 6)

    def linear(kw, kb, fan_in, fan_out):
        bound = 1.0 / math.sqrt(fan_in)
        w = jax.random.uniform(kw, (fan_in, fan_out), dtype, -bound, bound)
        b = jax.random.uniform(kb, (fan_out,), dtype, -bound, bound)
        return w, b

    w1, b1 = linear(keys[0], keys[1], z_dim, hidden_dim)
    w2, b2 = linear(keys[2], keys[3], hidden_dim, hidden_dim)
    w3, b3 = linear(keys[4], keys[5], hidden_dim, output_dim)
    return {"w1": w1, "b1": b1, "w2": w2, "b2": b2, "w3": w3, "b3": b3}


def _reference_forward(z, p):
    # Pure-JAX reference (exact erf GELU, f32), matching the PyTorch module.
    h1 = _gelu(z @ p["w1"] + p["b1"], approximate=False)
    h2 = _gelu(h1 @ p["w2"] + p["b2"], approximate=False)
    return h2 @ p["w3"] + p["b3"]


if __name__ == "__main__":
    key = jax.random.PRNGKey(0)
    k_params, k_z = jax.random.split(key)

    z_dim, hidden_dim, output_dim = 32, 128, 4
    batch = 8

    params = init_params(k_params, z_dim=z_dim, hidden_dim=hidden_dim, output_dim=output_dim)
    z = jax.random.normal(k_z, (batch, z_dim), dtype=jnp.float32)

    ref = _reference_forward(z, params)

    # Exact path: f32 weights + erf GELU -> matches PyTorch semantics tightly.
    prepared_f32 = prepare_params(params, use_bf16=False)
    out_exact = jax.block_until_ready(
        decoder_jet_forward(z, prepared_f32, approximate_gelu=False))
    assert out_exact.shape == (batch, output_dim)
    assert jnp.allclose(out_exact, ref, atol=1e-5, rtol=1e-5), "exact path mismatch vs reference"

    # Fast path: bf16 MXU inputs + tanh GELU (EUP).  Intentionally diverges from the
    # PyTorch reference numerics (documented accuracy tradeoff); looser tolerance.
    prepared_bf16 = prepare_params(params, use_bf16=True)
    out_fast = jax.block_until_ready(
        decoder_jet_forward(z, prepared_bf16, approximate_gelu=True))
    assert out_fast.shape == (batch, output_dim)
    assert jnp.allclose(out_fast, ref, atol=5e-2, rtol=5e-2), "fast path mismatch vs reference"

    print("KERNEL_OK")
</pallas_src>

<mosaic_0001>
module attributes {stable_mosaic.version = 11 : i64} {
  func.func @decoder_jet_kernel(%arg0: i32, %arg1: memref<8x32xf32, #tpu.memory_space<vmem>>, %arg2: memref<32x128xf32, #tpu.memory_space<vmem>>, %arg3: memref<1x128xf32, #tpu.memory_space<vmem>>, %arg4: memref<128x128xf32, #tpu.memory_space<vmem>>, %arg5: memref<1x128xf32, #tpu.memory_space<vmem>>, %arg6: memref<128x4xf32, #tpu.memory_space<vmem>>, %arg7: memref<1x4xf32, #tpu.memory_space<vmem>>, %arg8: memref<8x4xf32, #tpu.memory_space<vmem>>) attributes {dimension_semantics = [#tpu.dimension_semantics<parallel>], iteration_bounds = array<i64: 1>, scalar_prefetch = 0 : i64, scratch_operands = 0 : i64, tpu.core_type = #tpu.core_type<tc>, window_params = [{transform_indices = @transform_0, window_bounds = array<i64: 8, 32>}, {pipeline_mode = #tpu.pipeline_mode<synchronous>, transform_indices = @transform_1, window_bounds = array<i64: 32, 128>}, {pipeline_mode = #tpu.pipeline_mode<synchronous>, transform_indices = @transform_2, window_bounds = array<i64: 1, 128>}, {pipeline_mode = #tpu.pipeline_mode<synchronous>, transform_indices = @transform_3, window_bounds = array<i64: 128, 128>}, {pipeline_mode = #tpu.pipeline_mode<synchronous>, transform_indices = @transform_4, window_bounds = array<i64: 1, 128>}, {pipeline_mode = #tpu.pipeline_mode<synchronous>, transform_indices = @transform_5, window_bounds = array<i64: 128, 4>}, {pipeline_mode = #tpu.pipeline_mode<synchronous>, transform_indices = @transform_6, window_bounds = array<i64: 1, 4>}, {transform_indices = @transform_7, window_bounds = array<i64: 8, 4>}]} {
    %c0 = arith.constant 0 : index
    %c0_0 = arith.constant 0 : index
    %0 = vector.load %arg1[%c0, %c0_0] : memref<8x32xf32, #tpu.memory_space<vmem>>, vector<8x32xf32>
    %c0_1 = arith.constant 0 : index
    %c0_2 = arith.constant 0 : index
    %1 = vector.load %arg2[%c0_1, %c0_2] : memref<32x128xf32, #tpu.memory_space<vmem>>, vector<32x128xf32>
    %cst = arith.constant dense<0.000000e+00> : vector<8x128xf32>
    %2 = tpu.matmul %0, %1, %cst {dimension_numbers = #tpu.dot_dimension_numbers<[1], [0], [0], [1], [0, 0, 1, 1], [], []>} : vector<8x32xf32>, vector<32x128xf32>, vector<8x128xf32> -> vector<8x128xf32>
    %c0_3 = arith.constant 0 : index
    %c0_4 = arith.constant 0 : index
    %3 = vector.load %arg3[%c0_3, %c0_4] : memref<1x128xf32, #tpu.memory_space<vmem>>, vector<1x128xf32>
    %4 = vector.broadcast %3 : vector<1x128xf32> to vector<8x128xf32>
    %5 = arith.addf %2, %4 : vector<8x128xf32>
    %cst_5 = arith.constant 5.000000e-01 : f32
    %6 = vector.broadcast %cst_5 : f32 to vector<8x128xf32>
    %7 = arith.mulf %6, %5 : vector<8x128xf32>
    %cst_6 = arith.constant 0.707106769 : f32
    %8 = vector.broadcast %cst_6 : f32 to vector<8x128xf32>
    %9 = arith.mulf %5, %8 : vector<8x128xf32>
    %10 = math.erf %9 : vector<8x128xf32>
    %cst_7 = arith.constant 1.000000e+00 : f32
    %11 = vector.broadcast %cst_7 : f32 to vector<8x128xf32>
    %12 = arith.addf %11, %10 : vector<8x128xf32>
    %13 = arith.mulf %7, %12 : vector<8x128xf32>
    %c0_8 = arith.constant 0 : index
    %c0_9 = arith.constant 0 : index
    %14 = vector.load %arg4[%c0_8, %c0_9] : memref<128x128xf32, #tpu.memory_space<vmem>>, vector<128x128xf32>
    %cst_10 = arith.constant dense<0.000000e+00> : vector<8x128xf32>
    %15 = tpu.matmul %13, %14, %cst_10 {dimension_numbers = #tpu.dot_dimension_numbers<[1], [0], [0], [1], [0, 0, 1, 1], [], []>} : vector<8x128xf32>, vector<128x128xf32>, vector<8x128xf32> -> vector<8x128xf32>
    %c0_11 = arith.constant 0 : index
    %c0_12 = arith.constant 0 : index
    %16 = vector.load %arg5[%c0_11, %c0_12] : memref<1x128xf32, #tpu.memory_space<vmem>>, vector<1x128xf32>
    %17 = vector.broadcast %16 : vector<1x128xf32> to vector<8x128xf32>
    %18 = arith.addf %15, %17 : vector<8x128xf32>
    %cst_13 = arith.constant 5.000000e-01 : f32
    %19 = vector.broadcast %cst_13 : f32 to vector<8x128xf32>
    %20 = arith.mulf %19, %18 : vector<8x128xf32>
    %cst_14 = arith.constant 0.707106769 : f32
    %21 = vector.broadcast %cst_14 : f32 to vector<8x128xf32>
    %22 = arith.mulf %18, %21 : vector<8x128xf32>
    %23 = math.erf %22 : vector<8x128xf32>
    %cst_15 = arith.constant 1.000000e+00 : f32
    %24 = vector.broadcast %cst_15 : f32 to vector<8x128xf32>
    %25 = arith.addf %24, %23 : vector<8x128xf32>
    %26 = arith.mulf %20, %25 : vector<8x128xf32>
    %c0_16 = arith.constant 0 : index
    %c0_17 = arith.constant 0 : index
    %27 = vector.load %arg6[%c0_16, %c0_17] : memref<128x4xf32, #tpu.memory_space<vmem>>, vector<128x4xf32>
    %cst_18 = arith.constant dense<0.000000e+00> : vector<8x4xf32>
    %28 = tpu.matmul %26, %27, %cst_18 {dimension_numbers = #tpu.dot_dimension_numbers<[1], [0], [0], [1], [0, 0, 1, 1], [], []>} : vector<8x128xf32>, vector<128x4xf32>, vector<8x4xf32> -> vector<8x4xf32>
    %c0_19 = arith.constant 0 : index
    %c0_20 = arith.constant 0 : index
    %29 = vector.load %arg7[%c0_19, %c0_20] : memref<1x4xf32, #tpu.memory_space<vmem>>, vector<1x4xf32>
    %30 = vector.broadcast %29 : vector<1x4xf32> to vector<8x4xf32>
    %31 = arith.addf %28, %30 : vector<8x4xf32>
    %c0_21 = arith.constant 0 : index
    %c0_22 = arith.constant 0 : index
    %32 = vector.load %arg8[%c0_21, %c0_22] : memref<8x4xf32, #tpu.memory_space<vmem>>, vector<8x4xf32>
    tpu.vector_store %arg8[%c0_21, %c0_22], %31 {strides = array<i32>} : memref<8x4xf32, #tpu.memory_space<vmem>>, vector<8x4xf32>,
    return
  }
  func.func @transform_0(%arg0: i32) -> (i32, i32) {
    %c0_i32 = arith.constant 0 : i32
    %c0_i32_0 = arith.constant 0 : i32
    return %arg0, %c0_i32 : i32, i32
  }
  func.func @transform_1(%arg0: i32) -> (i32, i32) {
    %c0_i32 = arith.constant 0 : i32
    %c0_i32_0 = arith.constant 0 : i32
    %c0_i32_1 = arith.constant 0 : i32
    return %c0_i32, %c0_i32_0 : i32, i32
  }
  func.func @transform_2(%arg0: i32) -> (i32, i32) {
    %c0_i32 = arith.constant 0 : i32
    %c0_i32_0 = arith.constant 0 : i32
    %c0_i32_1 = arith.constant 0 : i32
    return %c0_i32, %c0_i32_0 : i32, i32
  }
  func.func @transform_3(%arg0: i32) -> (i32, i32) {
    %c0_i32 = arith.constant 0 : i32
    %c0_i32_0 = arith.constant 0 : i32
    %c0_i32_1 = arith.constant 0 : i32
    return %c0_i32, %c0_i32_0 : i32, i32
  }
  func.func @transform_4(%arg0: i32) -> (i32, i32) {
    %c0_i32 = arith.constant 0 : i32
    %c0_i32_0 = arith.constant 0 : i32
    %c0_i32_1 = arith.constant 0 : i32
    return %c0_i32, %c0_i32_0 : i32, i32
  }
  func.func @transform_5(%arg0: i32) -> (i32, i32) {
    %c0_i32 = arith.constant 0 : i32
    %c0_i32_0 = arith.constant 0 : i32
    %c0_i32_1 = arith.constant 0 : i32
    return %c0_i32, %c0_i32_0 : i32, i32
  }
  func.func @transform_6(%arg0: i32) -> (i32, i32) {
    %c0_i32 = arith.constant 0 : i32
    %c0_i32_0 = arith.constant 0 : i32
    %c0_i32_1 = arith.constant 0 : i32
    return %c0_i32, %c0_i32_0 : i32, i32
  }
  func.func @transform_7(%arg0: i32) -> (i32, i32) {
    %c0_i32 = arith.constant 0 : i32
    %c0_i32_0 = arith.constant 0 : i32
    return %arg0, %c0_i32 : i32, i32
  }
}

</mosaic_0001>

<bundles_post_ra>
// kernel: tpu_custom_call.1
= control target key start
LH: loop header
LB: loop body
LE: loop exit
PB: predicated region body
PF: predicated region fallthrough
CT: control target
= control target key end

     0   :  { %12 = vsyncpa [#allocation3], 0  ;;  %s722_s0 = inlined_call_operand.vmem [shape: f32[8,32], index: 0, kind: input, shape index: {}]   ;;  %s723_s1 = inlined_call_operand.hbm [shape: f32[32,128], index: 1, kind: input, shape index: {}]   ;;  %s724_s2 = inlined_call_operand.vmem [shape: f32[1,128], index: 2, kind: input, shape index: {}]   ;;  %s725_s3 = inlined_call_operand.vmem [shape: f32[128,128], index: 3, kind: input, shape index: {}]   ;;  %s726_s4 = inlined_call_operand.hbm [shape: f32[1,128], index: 4, kind: input, shape index: {}]   ;;  %s727_s5 = inlined_call_operand.vmem [shape: f32[128,4], index: 5, kind: input, shape index: {}]   ;;  %s728_s6 = inlined_call_operand.vmem [shape: f32[1,4], index: 6, kind: input, shape index: {}]   ;;  %s729_s7 = inlined_call_operand.vmem [shape: f32[8,4], index: 7, kind: output, shape index: {}]  }
   0x1   :  { %13 = vsyncpa [#allocation5], 0  ;;  %s520_s24 = smov [#allocation2]  }
   0x2   :  { %s21_s25 = sshll.u32 %s520_s24, 4  ;;  %s22_s25 = int_to_ptr.vmem [resolvable:$true] %s21_s25 }
   0x3   :  { %s484_s26 = scalar_lea.vmem %s22_s25, 512  ;;  %p489_p1 = scmp.lt.s32.totalorder %s22_s25, %s22_s25 }
   0x4   :  { %p485_p0 = scmp.ne.s32.totalorder %s22_s25, %s484_s26  ;;  %p490_p2 = scmp.lt.s32.totalorder %s484_s26, %s484_s26 }
   0x6   :  { %p491_p3 = por %p490_p2, %p489_p1 }
   0x8   :  { %p492_p4 = pnand %p491_p3, %p485_p0 }
   0xa   :  { %495 = shalt.err (!%p492_p4)
}
   0xb   :  { %s521_s27 = smov 128   ;;  %s522_s28 = smov 8  }
   0xc   :  { %27 = dma.hbm_to_vmem [thread:$0]  %s723_s1, 512, %s22_s25, [#allocation3], %s521_s27, %s521_s27, %s522_s28  }
   0xd   :  { %s523_s8 = smov [#allocation4]  }
   0xe   :  { %s38_s9 = sshll.u32 %s523_s8, 4  ;;  %s39_s9 = int_to_ptr.vmem [resolvable:$true] %s38_s9 }
   0xf   :  { %s504_s10 = scalar_lea.vmem %s39_s9, 16  ;;  %s508_s11 = scalar_lea.vmem %s39_s9, 32 }
  0x10   :  { %p505_p5 = scmp.ne.s32.totalorder %s39_s9, %s504_s10  ;;  %p509_p6 = scmp.lt.s32.totalorder %s39_s9, %s39_s9 }
  0x11   :  { %p510_p7 = scmp.lt.s32.totalorder %s508_s11, %s504_s10 }
  0x13   :  { %p511_p8 = por %p510_p7, %p509_p6 }
  0x15   :  { %p512_p9 = pnand %p511_p8, %p505_p5 }
  0x17   :  { %515 = shalt.err (!%p512_p9)
}
  0x18   :  { %41 = dma.hbm_to_vmem [thread:$0]  %s726_s4, 16, %s39_s9, [#allocation5]  }
  0x19   :  { %516 = dma.done.wait [#allocation3], 512  }
  0x1a   :  { %517 = vsyncadd [#allocation3], 4294966784 }
  0x1b   :  { %518 = dma.done.wait [#allocation5], 16  }
  0x1c   :  { %519 = vsyncadd [#allocation5], 4294967280  ;;  %v524_v0 = vmov 0.0   ;;  %vm525_vm0 = vmmov 0   ;;  %v56_v1 = vld [vmem:[#allocation2 + $0x18] sm:$0xff]  ;;  %v55_v2 = vld [vmem:[#allocation2 + $0x10] sm:$0xff] }
  0x1d   :  { %385 = vmatprep.subr.mxu0 %v524_v0  ;;  %393 = vmatprep.mubr.msk.f32.mxu0 %vm525_vm0, %v524_v0  ;;  %v158_v3 = vld [vmem:[%s725_s3 + $0x78] sm:$0xff]  ;;  %v54_v4 = vld [vmem:[#allocation2 + $0x8] sm:$0xff]  ;;  %v157_v5 = vld [vmem:[%s725_s3 + $0x70] sm:$0xff]  ;;  %vm64_vm1 = vcmask 261120   ;;  %vm334_vm2 = vcmask 31744  }
  0x1e   :  { %396 = vmatprep.subr.mxu1 %v524_v0  ;;  %428 = vmatprep.mubr.msk.f32.mxu1 %vm525_vm0, %v524_v0  ;;  %v156_v6 = vld [vmem:[%s725_s3 + $0x68] sm:$0xff]  ;;  %v53_v7 = vld [vmem:[#allocation2] sm:$0xff]  ;;  %v154_v10 = vld [vmem:[%s725_s3 + $0x58] sm:$0xff] }
  0x1f   :  { %386 = vmatpush3.msra.mxu0 %v56_v1  ;;  %397 = vmatpush3.msra.mxu1 %v158_v3  ;;  %v52_v8 = vld [vmem:[%s722_s0] sm:$0xff]  ;;  %v153_v11 = vld [vmem:[%s725_s3 + $0x50] sm:$0xff]  ;;  %v152_v12 = vld [vmem:[%s725_s3 + $0x48] sm:$0xff] }
  0x20   :  { %387 = vmatprep.subr.mxu0 %v524_v0  ;;  %398 = vmatprep.subr.mxu1 %v524_v0  ;;  %v155_v9 = vld [vmem:[%s725_s3 + $0x60] sm:$0xff]  ;;  %v150_v14 = vld [vmem:[%s725_s3 + $0x38] sm:$0xff]  ;;  %v149_v15 = vld [vmem:[%s725_s3 + $0x30] sm:$0xff] }
  0x21   :  { %388 = vmatpush3.msra.mxu0 %v55_v2  ;;  %399 = vmatpush3.msra.mxu1 %v157_v5  ;;  %v151_v13 = vld [vmem:[%s725_s3 + $0x40] sm:$0xff]  ;;  %v148_v16 = vld [vmem:[%s725_s3 + $0x28] sm:$0xff]  ;;  %v146_v18 = vld [vmem:[%s725_s3 + $0x18] sm:$0xff] }
  0x22   :  { %389 = vmatprep.subr.mxu0 %v524_v0  ;;  %400 = vmatprep.subr.mxu1 %v524_v0  ;;  %v147_v17 = vld [vmem:[%s725_s3 + $0x20] sm:$0xff]  ;;  %v145_v19 = vld [vmem:[%s725_s3 + $0x10] sm:$0xff]  ;;  %v144_v20 = vld [vmem:[%s725_s3 + $0x8] sm:$0xff] }
  0x23   :  { %390 = vmatpush3.msra.mxu0 %v54_v4  ;;  %401 = vmatpush3.msra.mxu1 %v156_v6  ;;  %v143_v21 = vld [vmem:[%s725_s3] sm:$0xff]  ;;  %v256_v22 = vld [vmem:[%s727_s5 + $0x78] sm:$0xff]  ;;  %v255_v23 = vld [vmem:[%s727_s5 + $0x70] sm:$0xff] }
  0x24   :  { %391 = vmatprep.subr.mxu0 %v524_v0  ;;  %402 = vmatprep.subr.mxu1 %v524_v0  ;;  %v254_v24 = vld [vmem:[%s727_s5 + $0x68] sm:$0xff]  ;;  %v253_v25 = vld [vmem:[%s727_s5 + $0x60] sm:$0xff]  ;;  %v252_v35 = vld [vmem:[%s727_s5 + $0x58] sm:$0xff] }
  0x25   :  { %392 = vmatpush3.msra.mxu0 %v53_v7  ;;  %403 = vmatpush3.msra.mxu1 %v155_v9  ;;  %v342_v26 = vld [vmem:[%s724_s2] ss:$0 sm:$0xff]  ;;  %v251_v36 = vld [vmem:[%s727_s5 + $0x50] sm:$0xff]  ;;  %v250_v37 = vld [vmem:[%s727_s5 + $0x48] sm:$0xff] }
  0x26   :  { %394 = vmatmul.mubr.msk.f32.vlgmr.msra.gmra.mxu0 %vm64_vm1, %v52_v8  ;;  %404 = vmatprep.subr.mxu1 %v524_v0  ;;  %v249_v38 = vld [vmem:[%s727_s5 + $0x40] sm:$0xff]  ;;  %v248_v39 = vld [vmem:[%s727_s5 + $0x38] sm:$0xff]  ;;  %v247_v40 = vld [vmem:[%s727_s5 + $0x30] sm:$0xff] }
  0x27   :  { %431 = vmatprep.subr.mxu0 %v524_v0  ;;  %463 = vmatprep.mubr.msk.f32.mxu0 %vm525_vm0, %v524_v0  ;;  %v246_v41 = vld [vmem:[%s727_s5 + $0x28] sm:$0xff]  ;;  %v245_v42 = vld [vmem:[%s727_s5 + $0x20] sm:$0xff]  ;;  %v244_v43 = vld [vmem:[%s727_s5 + $0x18] sm:$0xff] }
  0x28   :  { %405 = vmatpush3.msra.mxu1 %v154_v10  ;;  %432 = vmatpush3.msra.mxu0 %v256_v22  ;;  %v243_v44 = vld [vmem:[%s727_s5 + $0x10] sm:$0xff]  ;;  %v242_v45 = vld [vmem:[%s727_s5 + $0x8] sm:$0xff]  ;;  %v241_v46 = vld [vmem:[%s727_s5] sm:$0xff] }
  0x29   :  { %406 = vmatprep.subr.mxu1 %v524_v0  ;;  %433 = vmatprep.subr.mxu0 %v524_v0  ;;  %v344_v47 = vld [vmem:[#allocation4] ss:$0 sm:$0xff] }
  0x2a   :  { %407 = vmatpush3.msra.mxu1 %v153_v11  ;;  %434 = vmatpush3.msra.mxu0 %v255_v23  ;;  %v345_v56 = vld [vmem:[%s728_s6] ss:$0 sm:$0xff] }
  0x2b   :  { %408 = vmatprep.subr.mxu1 %v524_v0  ;;  %435 = vmatprep.subr.mxu0 %v524_v0 }
  0x2c   :  { %409 = vmatpush3.msra.mxu1 %v152_v12  ;;  %436 = vmatpush3.msra.mxu0 %v254_v24 }
  0x2d   :  { %410 = vmatprep.subr.mxu1 %v524_v0  ;;  %437 = vmatprep.subr.mxu0 %v524_v0 }
  0x2e   :  { %411 = vmatpush3.msra.mxu1 %v151_v13  ;;  %438 = vmatpush3.msra.mxu0 %v253_v25 }
  0x2f   :  { %412 = vmatprep.subr.mxu1 %v524_v0  ;;  %439 = vmatprep.subr.mxu0 %v524_v0 }
  0x30   :  { %413 = vmatpush3.msra.mxu1 %v150_v14  ;;  %440 = vmatpush3.msra.mxu0 %v252_v35 }
  0x31   :  { %414 = vmatprep.subr.mxu1 %v524_v0  ;;  %441 = vmatprep.subr.mxu0 %v524_v0 }
  0x32   :  { %415 = vmatpush3.msra.mxu1 %v149_v15  ;;  %442 = vmatpush3.msra.mxu0 %v251_v36 }
  0x33   :  { %416 = vmatprep.subr.mxu1 %v524_v0  ;;  %443 = vmatprep.subr.mxu0 %v524_v0 }
  0x34   :  { %417 = vmatpush3.msra.mxu1 %v148_v16  ;;  %444 = vmatpush3.msra.mxu0 %v250_v37 }
  0x35   :  { %418 = vmatprep.subr.mxu1 %v524_v0  ;;  %445 = vmatprep.subr.mxu0 %v524_v0 }
  0x36   :  { %419 = vmatpush3.msra.mxu1 %v147_v17  ;;  %446 = vmatpush3.msra.mxu0 %v249_v38 }
  0x37   :  { %420 = vmatprep.subr.mxu1 %v524_v0  ;;  %447 = vmatprep.subr.mxu0 %v524_v0 }
  0x38   :  { %421 = vmatpush3.msra.mxu1 %v146_v18  ;;  %448 = vmatpush3.msra.mxu0 %v248_v39 }
  0x39   :  { %422 = vmatprep.subr.mxu1 %v524_v0  ;;  %449 = vmatprep.subr.mxu0 %v524_v0 }
  0x3a   :  { %423 = vmatpush3.msra.mxu1 %v145_v19  ;;  %450 = vmatpush3.msra.mxu0 %v247_v40 }
  0x3b   :  { %424 = vmatprep.subr.mxu1 %v524_v0  ;;  %451 = vmatprep.subr.mxu0 %v524_v0 }
  0x3c   :  { %425 = vmatpush3.msra.mxu1 %v144_v20  ;;  %452 = vmatpush3.msra.mxu0 %v246_v41 }
  0x3d   :  { %426 = vmatprep.subr.mxu1 %v524_v0  ;;  %453 = vmatprep.subr.mxu0 %v524_v0 }
  0x3e   :  { %427 = vmatpush3.msra.mxu1 %v143_v21  ;;  %454 = vmatpush3.msra.mxu0 %v245_v42 }
  0x3f   :  { %455 = vmatprep.subr.mxu0 %v524_v0 }
  0x40   :  { %456 = vmatpush3.msra.mxu0 %v244_v43 }
  0x41   :  { %457 = vmatprep.subr.mxu0 %v524_v0 }
  0x42   :  { %458 = vmatpush3.msra.mxu0 %v243_v44 }
  0x43   :  { %459 = vmatprep.subr.mxu0 %v524_v0 }
  0x44   :  { %460 = vmatpush3.msra.mxu0 %v242_v45 }
  0x45   :  { %461 = vmatprep.subr.mxu0 %v524_v0 }
  0x46   :  { %462 = vmatpush3.msra.mxu0 %v241_v46 }
  0xe6   :  { %v134_v27 = vpop.f32.mrf.mxu0 }
  0xe7   :  { %v135_v28 = vadd.f32 %v342_v26, %v134_v27 }
  0xe8   :  { %v395_v29 = vpop.f32.mrf.mxu0 }
  0xe9   :  { %v139_v30 = vmul.f32 0.70710677, %v135_v28  ;;  %v138_v32 = vmul.f32 0.5, %v135_v28 }
  0xeb   :  { %472 = verf.f32 %v139_v30 }
  0xf8   :  { %v473_v31 = vpop.eup %472 }
  0xf9   :  { %v141_v33 = vadd.f32 1.0, %v473_v31 }
  0xfb   :  { %v142_v34 = vmul.f32 %v141_v33, %v138_v32 }
  0xfd   :  { %429 = vmatmul.mubr.f32.vlgmr.msra.gmra.mxu1 %v142_v34 }
 0x1bd   :  { %v232_v48 = vpop.f32.mrf.mxu1 }
 0x1be   :  { %v233_v49 = vadd.f32 %v344_v47, %v232_v48 }
 0x1bf   :  { %v430_v50 = vpop.f32.mrf.mxu1 }
 0x1c0   :  { %v237_v51 = vmul.f32 0.70710677, %v233_v49  ;;  %v236_v53 = vmul.f32 0.5, %v233_v49 }
 0x1c2   :  { %474 = verf.f32 %v237_v51 }
 0x1cf   :  { %v475_v52 = vpop.eup %474 }
 0x1d0   :  { %v239_v54 = vadd.f32 1.0, %v475_v52 }
 0x1d2   :  { %v240_v55 = vmul.f32 %v239_v54, %v236_v53 }
 0x1d4   :  { %464 = vmatmul.mubr.f32.vlgmr.msra.gmra.mxu0 %v240_v55 }
 0x294   :  { %v330_v57 = vpop.f32.mrf.mxu0 }
 0x295   :  { %v331_v58 = vadd.f32 %v345_v56, %v330_v57 }
 0x296   :  { %v465_v59 = vpop.f32.mrf.mxu0 }
 0x297   :  { %335 = vst.msk [vmem:[%s729_s7] sm:$0xff] %vm334_vm2, %v331_v58 }
 0x298   :  { %340 = vsyncpa [#allocation3], 1 }
 0x299   :  { %341 = vsyncpa [#allocation5], 1 }

</bundles_post_ra>
